<compile_context>
chip_gen: v6e
topology: v6e:2x2x1
jax: 0.10.0
libtpu: 0.0.40
codegen_flags: <defaults>
</compile_context>

<pallas_src>
import functools

import jax
import jax.numpy as jnp
from jax.experimental import pallas as pl
from jax.experimental.pallas import tpu as pltpu

_TINY_BYTES = 2 * 1024 * 1024  # below this the fused XLA reshape+max wins


def _round_up(x: int, m: int) -> int:
    return ((x + m - 1) // m) * m


@functools.lru_cache(maxsize=1)
def _tpu_generation():
    """Best-effort (num_tensorcores, vmem_capacity_bytes) for this chip."""
    num_cores = 1
    vmem_cap = 128 * 1024 * 1024
    try:
        info = pltpu.get_tpu_info()
        v = getattr(info, "vmem_capacity_bytes", None)
        if v:
            vmem_cap = int(v)
        for attr in ("num_cores", "core_count", "num_tensorcores",
                     "tensorcores_per_chip", "cores_per_chip"):
            c = getattr(info, attr, None)
            if c:
                num_cores = int(c)
                break
    except Exception:
        pass
    try:
        kind = jax.devices()[0].device_kind.lower()
        if "7" in kind:                      # v7x: 2 TCs / chip, 64 MiB VMEM / TC
            num_cores = max(num_cores, 2)
            vmem_cap = min(vmem_cap, 64 * 1024 * 1024)
        elif "v4" in kind or "v5p" in kind:  # megacore parts
            num_cores = max(num_cores, 2)
    except Exception:
        pass
    return min(num_cores, 2), vmem_cap


def _pick_dense_width(groups: int, cap: int = 2048) -> int:
    """Largest 128-multiple W <= cap with W | groups (prefer >= 8 rows)."""
    if groups < 128 or groups % 128 != 0:
        return 0
    kmax = min(cap, groups) // 128
    for want_rows in (8, 1):
        for k in range(kmax, 0, -1):
            w = 128 * k
            if groups % w == 0 and groups // w >= want_rows:
                return w
    return 0


def _maxout_kernel(x_ref, o_ref, *, pool_size: int):
    # x_ref: (tm, tf * pool_size)   o_ref: (tm, tf)
    x = x_ref[...]
    tm, w = x.shape
    tf = w // pool_size
    if pool_size == 1:
        o_ref[...] = x
        return
    # Roll-tree over the lane axis: after the loop, lane i holds
    # max(x[i - pool_size + 1 .. i]), so the LAST slot of every pool
    # (lane g*p + p - 1) holds that pool's max.  pltpu.roll follows np.roll
    # semantics (roll(v, s)[i] == v[i - s]); rolls occupy the XLU slot and the
    # maxima the VPU slot, keeping all operands lane-dense in the input dtype.
    # For valid pools the window never crosses into padded (ragged) lanes.
    acc = x
    covered = 1
    while covered < pool_size:
        step = min(covered, pool_size - covered)
        acc = jnp.maximum(acc, pltpu.roll(acc, shift=step, axis=1))
        covered += step
    # Single strided extraction (one pass) instead of pool_size strided slices.
    o_ref[...] = acc.reshape(tm, tf, pool_size)[:, :, pool_size - 1]


def _maxout_pallas(x2: jax.Array, pool_size: int) -> jax.Array:
    n_rows, last = x2.shape
    out_last = last // pool_size
    itemsize = jnp.dtype(x2.dtype).itemsize
    num_cores, vmem_cap = _tpu_generation()

    # Generation-aware working-set budget: 2 pipeline buffers x (in + out).
    if vmem_cap <= 64 * 1024 * 1024:          # v7x-class: 64 MiB per TC
        ws_budget, vmem_limit = 24 * 1024 * 1024, 48 * 1024 * 1024
    else:                                     # v5e / v6e: 128 MiB
        ws_budget, vmem_limit = 40 * 1024 * 1024, 80 * 1024 * 1024

    # Feature tile: whole row when it fits (single contiguous DMA per block),
    # else a 128-multiple so only the last feature block has masked stores.
    tf = out_last if out_last <= 2048 else 512

    # Sublane quantum: 8 rows for 4-byte, 16 for 2-byte, 32 for 1-byte dtypes.
    q = max(8, 32 // max(itemsize, 1))

    per_row_bytes = (tf * pool_size + tf) * itemsize
    tm = max(ws_budget // (2 * per_row_bytes), 1)
    if tm >= n_rows:
        tm = n_rows                            # one full-extent row block
    else:
        tm = max((tm // q) * q, q)

    n_feat_blk = pl.cdiv(out_last, tf)
    n_row_blk = pl.cdiv(n_rows, tm)

    # Multi-TensorCore chips (v7x): give every core >= 2 row blocks so both
    # cores stream and DMA/compute/writeback overlap.  Single-TC chips
    # (v5e/v6e) keep one big block -- splitting there is pure overhead.
    if num_cores > 1 and n_row_blk * n_feat_blk < 2 * num_cores:
        target = min(2 * num_cores, max(n_rows // q, 1))
        if target > n_row_blk:
            tm = min(_round_up(pl.cdiv(n_rows, target), q), n_rows)
            n_row_blk = pl.cdiv(n_rows, tm)

    cost = pl.CostEstimate(
        flops=n_rows * out_last * max(pool_size - 1, 0),
        transcendentals=0,
        bytes_accessed=(n_rows * last + n_rows * out_last) * itemsize,
    )

    return pl.pallas_call(
        functools.partial(_maxout_kernel, pool_size=pool_size),
        out_shape=jax.ShapeDtypeStruct((n_rows, out_last), x2.dtype),
        grid_spec=pltpu.PrefetchScalarGridSpec(
            num_scalar_prefetch=0,
            grid=(n_row_blk, n_feat_blk),
            in_specs=[pl.BlockSpec((tm, tf * pool_size), lambda i, j: (i, j))],
            out_specs=pl.BlockSpec((tm, tf), lambda i, j: (i, j)),
        ),
        compiler_params=pltpu.CompilerParams(
            dimension_semantics=("parallel", "parallel"),
            vmem_limit_bytes=vmem_limit,
        ),
        cost_estimate=cost,
    )(x2)
    # Tuning note: pipeline_mode=pl.Buffered(3) on the input spec is a cheap
    # sweep for few-step grids; left at the default 2-deep buffering here.


def maxout(x: jax.Array, pool_size: int, *, force_pallas: bool = False) -> jax.Array:
    """Keep the max of every `pool_size` consecutive elements of the last dim."""
    *lead, last = x.shape
    assert last % pool_size == 0, "last dim must be divisible by pool_size"
    out_last = last // pool_size
    if pool_size == 1:
        return x

    itemsize = jnp.dtype(x.dtype).itemsize
    if x.size * itemsize < _TINY_BYTES and not force_pallas:
        return jnp.max(x.reshape(*lead, out_last, pool_size), axis=-1)

    groups = x.size // pool_size

    # Preferred path: lane-dense synthetic (rows, W*pool_size) view.  Pools are
    # contiguous and never straddle synthetic rows, so this is exact; no
    # padding is ever folded into a kept output.
    w = _pick_dense_width(groups)
    if w:
        rows = groups // w
        out2 = _maxout_pallas(x.reshape(rows, w * pool_size), pool_size)
        return out2.reshape(*lead, out_last)

    # Fallback: natural (rows, last) view (pool count not a 128-multiple).
    n_rows = x.size // last
    out2 = _maxout_pallas(x.reshape(n_rows, last), pool_size)
    return out2.reshape(*lead, out_last)


if __name__ == "__main__":
    key = jax.random.PRNGKey(0)
    k0, k1, k2, k3 = jax.random.split(key, 4)

    def ref(x, p):
        *lead, last = x.shape
        return jnp.max(x.reshape(*lead, last // p, p), axis=-1)

    # Small shape consistent with the module: (batch=2, seq=8, hidden=32), pool 4.
    p = 4
    x_small = jax.random.normal(k0, (2, 8, 32), dtype=jnp.float32)
    out_small = jax.block_until_ready(maxout(x_small, p, force_pallas=True))
    assert out_small.shape == (2, 8, 8)
    assert jnp.array_equal(out_small, ref(x_small, p)), "pallas (small) mismatch"

    # Default dispatch on the tiny shape takes the fused-jnp fallback.
    out_fb = jax.block_until_ready(maxout(x_small, p))
    assert jnp.array_equal(out_fb, ref(x_small, p)), "fallback mismatch"

    # Larger shape: exercises the lane-dense re-chunked Pallas path.
    x_med = jax.random.normal(k1, (2, 128, 1024), dtype=jnp.float32)
    out_med = jax.block_until_ready(maxout(x_med, p, force_pallas=True))
    assert out_med.shape == (2, 128, 256)
    assert jnp.array_equal(out_med, ref(x_med, p)), "pallas (tiled) mismatch"

    # bf16, pool 2 (input dtype preserved in-kernel).
    x_bf = jax.random.normal(k2, (4, 64, 256), dtype=jnp.bfloat16)
    out_bf = jax.block_until_ready(maxout(x_bf, 2, force_pallas=True))
    assert jnp.array_equal(out_bf, ref(x_bf, 2)), "pallas (bf16) mismatch"

    # Non-power-of-two pool size (generalized roll-tree).
    x_p3 = jax.random.normal(k3, (2, 8, 96), dtype=jnp.float32)
    out_p3 = jax.block_until_ready(maxout(x_p3, 3, force_pallas=True))
    assert jnp.array_equal(out_p3, ref(x_p3, 3)), "pallas (pool=3) mismatch"

    print("KERNEL_OK")
</pallas_src>

<mosaic_0001>
module attributes {stable_mosaic.version = 11 : i64} {
  func.func @_maxout_kernel(%arg0: i32, %arg1: i32, %arg2: memref<1x512xf32, #tpu.memory_space<vmem>>, %arg3: memref<1x128xf32, #tpu.memory_space<vmem>>) attributes {dimension_semantics = [#tpu.dimension_semantics<parallel>, #tpu.dimension_semantics<parallel>], iteration_bounds = array<i64: 1, 1>, scalar_prefetch = 0 : i64, scratch_operands = 0 : i64, tpu.core_type = #tpu.core_type<tc>, window_params = [{transform_indices = @transform_0, window_bounds = array<i64: 1, 512>}, {transform_indices = @transform_1, window_bounds = array<i64: 1, 128>}]} {
    %c0 = arith.constant 0 : index
    %c0_0 = arith.constant 0 : index
    %0 = vector.load %arg2[%c0, %c0_0] : memref<1x512xf32, #tpu.memory_space<vmem>>, vector<1x512xf32>
    %c1_i32 = arith.constant 1 : i32
    %1 = tpu.dynamic_rotate %0 by %c1_i32 dim 1 : vector<1x512xf32>, i32 -> vector<1x512xf32>
    %2 = arith.maximumf %0, %1 : vector<1x512xf32>
    %c2_i32 = arith.constant 2 : i32
    %3 = tpu.dynamic_rotate %2 by %c2_i32 dim 1 : vector<1x512xf32>, i32 -> vector<1x512xf32>
    %4 = arith.maximumf %2, %3 : vector<1x512xf32>
    %5 = vector.shape_cast %4 : vector<1x512xf32> to vector<1x128x4xf32>
    %6 = vector.extract_strided_slice %5 {offsets = [0, 0, 3], sizes = [1, 128, 1], strides = [1, 1, 1]} : vector<1x128x4xf32> to vector<1x128x1xf32>
    %7 = vector.shape_cast %6 : vector<1x128x1xf32> to vector<1x128xf32>
    %c0_1 = arith.constant 0 : index
    %c0_2 = arith.constant 0 : index
    %8 = vector.load %arg3[%c0_1, %c0_2] : memref<1x128xf32, #tpu.memory_space<vmem>>, vector<1x128xf32>
    tpu.vector_store %arg3[%c0_1, %c0_2], %7 {strides = array<i32>} : memref<1x128xf32, #tpu.memory_space<vmem>>, vector<1x128xf32>,
    return
  }
  func.func @transform_0(%arg0: i32, %arg1: i32) -> (i32, i32) {
    %c0_i32 = arith.constant 0 : i32
    return %arg0, %arg1 : i32, i32
  }
  func.func @transform_1(%arg0: i32, %arg1: i32) -> (i32, i32) {
    %c0_i32 = arith.constant 0 : i32
    return %arg0, %arg1 : i32, i32
  }
}

</mosaic_0001>

<bundles_post_ra>
// kernel: tpu_custom_call.1
= control target key start
LH: loop header
LB: loop body
LE: loop exit
PB: predicated region body
PF: predicated region fallthrough
CT: control target
= control target key end

     0   :  { %6 = vsyncpa [#allocation3], 0  ;;  %s1855_s0 = inlined_call_operand.hbm [shape: f32[1,512], index: 0, kind: input, shape index: {}]   ;;  %s1856_s1 = inlined_call_operand.hbm [shape: f32[1,128], index: 1, kind: output, shape index: {}]  }
   0x1   :  { %7 = vsyncpa [#allocation4], 0  ;;  %s1352_s6 = smov [#allocation2]  }
   0x2   :  { %s14_s7 = sshll.u32 %s1352_s6, 4  ;;  %s15_s7 = int_to_ptr.vmem [resolvable:$true] %s14_s7 }
   0x3   :  { %s1316_s8 = scalar_lea.vmem %s15_s7, 64  ;;  %p1321_p1 = scmp.lt.s32.totalorder %s15_s7, %s15_s7 }
   0x4   :  { %p1317_p0 = scmp.ne.s32.totalorder %s15_s7, %s1316_s8  ;;  %p1322_p2 = scmp.lt.s32.totalorder %s1316_s8, %s1316_s8 }
   0x6   :  { %p1323_p3 = por %p1322_p2, %p1321_p1 }
   0x8   :  { %p1324_p4 = pnand %p1323_p3, %p1317_p0 }
   0xa   :  { %1327 = shalt.err (!%p1324_p4)
}
   0xb   :  { %17 = dma.hbm_to_vmem [thread:$0]  %s1855_s0, 64, %s15_s7, [#allocation3]  }
   0xc   :  { %1348 = dma.done.wait [#allocation3], 64  }
   0xd   :  { %1349 = vsyncadd [#allocation3], 4294967232  ;;  %v23_v0 = vlaneseq  ;;  %v21_v6 = vld [vmem:[#allocation2] sm:$0xf]  ;;  %s1353_s11 = smov 1   ;;  %s1355_s0 = smov 2  }
   0xe   :  { %v1354_v11 = vmov 1966171168   ;;  %s1356_s12 = smov 120   ;;  %s1357_s13 = smov 124   ;;  %v1362_v50 = vmov 3   ;;  %vm1152_vm2 = vcmask 130112  }
   0xf   :  { %v1402_v1 = vshrl.u32 %v23_v0, 7  ;;  %v65_v12 = vunpack.c.l.s4 %v1354_v11  ;;  %v1408_v13 = vand.u32 127, %v23_v0  ;;  %s1358_s14 = smov 112   ;;  %s1359_s15 = smov 116   ;;  %1306 = vset.pattern.permute.xlu1 %v1362_v50  ;;  %1307 = vset.pattern.permute.xlu0 %v1362_v50  ;;  %vm1159_vm3 = vcmask 195712  }
  0x10   :  { %s1360_s16 = smov 104   ;;  %s1361_s17 = smov 108   ;;  %vm1166_vm4 = vcmask 261312   ;;  %vm1173_vm5 = vcmask 326912   ;;  %vm1180_vm6 = vcmask 392512   ;;  %vm1187_vm7 = vcmask 458112  }
  0x11   :  { %v33_v2 = vsub.s32 2, %v1402_v1  ;;  %v25_v3 = vsub.s32 0, %v1402_v1  ;;  %v37_v4 = vsub.s32 3, %v1402_v1  ;;  %v29_v5 = vsub.s32 1, %v1402_v1  ;;  %s1363_s18 = smov 96   ;;  %s1364_s19 = smov 100  }
  0x12   :  { %v66_v16 = vunpack.c.0.s8 %v65_v12  ;;  %vm53_vm0 = vcmp.lt.s32.totalorder %v1408_v13, 1  ;;  %vm117_vm1 = vcmp.lt.s32.totalorder %v1408_v13, 2  ;;  %s1365_s20 = smov 88   ;;  %s1366_s21 = smov 92   ;;  %vm1194_vm8 = vcmask 523712  }
  0x13   :  { %v34_v7 = vrot.slane %v21_v6, %v33_v2  ;;  %v26_v8 = vrot.slane %v21_v6, %v25_v3  ;;  %v38_v9 = vrot.slane %v21_v6, %v37_v4  ;;  %v30_v10 = vrot.slane %v21_v6, %v29_v5  ;;  %s1367_s22 = smov 80   ;;  %s1368_s23 = smov 84  }
  0x14   :  { %v1412_v18 = vsub.s32 %v66_v16, %v1402_v1  ;;  %s1369_s24 = smov 72   ;;  %s1370_s25 = smov 76   ;;  %vm1201_vm9 = vcmask 589312   ;;  %vm1208_vm10 = vcmask 654912   ;;  %vm1215_vm11 = vcmask 720512  }
  0x15   :  { %47 = vrot.lane.b32.xlu1 %v34_v7, %s1353_s11  ;;  %43 = vrot.lane.b32.xlu0 %v26_v8, %s1353_s11  ;;  %s1371_s26 = smov 64   ;;  %s1372_s27 = smov 68   ;;  %vm1222_vm12 = vcmask 786112   ;;  %vm1229_vm13 = vcmask 851712   ;;  %vm1236_vm14 = vcmask 917312   ;;  %vm1243_vm15 = vcmask 982912  }
  0x16   :  { %s1373_s28 = smov 56   ;;  %s1374_s29 = smov 60  }
  0x17   :  { %s1375_s30 = smov 48   ;;  %s1376_s2 = smov 52  }
  0x18   :  { %s1377_s3 = smov 40   ;;  %s1378_s4 = smov 44  }
  0x19   :  { %49 = vrot.lane.b32.xlu1 %v38_v9, %s1353_s11  ;;  %45 = vrot.lane.b32.xlu0 %v30_v10, %s1353_s11  ;;  %s1379_s5 = smov 32   ;;  %s1380_s6 = smov 36  }
  0x1a   :  { %s1381_s7 = smov 24   ;;  %s1382_s8 = smov 28  }
  0x1b   :  { %s1383_s9 = smov 16   ;;  %s1384_s10 = smov 20  }
  0x1c   :  { %s1385_s11 = smov 8  }
  0x87   :  { %v48_v14 = vpop.permute.xlu1 %47  ;;  %v44_v15 = vpop.permute.xlu0 %43 }
  0x8b   :  { %v50_v17 = vpop.permute.xlu1 %49  ;;  %v46_v19 = vpop.permute.xlu0 %45 }
  0x8c   :  { %v54_v20 = vsel %vm53_vm0, %v48_v14, %v50_v17  ;;  %v57_v21 = vsel %vm53_vm0, %v50_v17, %v44_v15  ;;  %v55_v22 = vsel %vm53_vm0, %v46_v19, %v48_v14  ;;  %v56_v23 = vsel %vm53_vm0, %v44_v15, %v46_v19 }
  0x8d   :  { %v62_v24 = vcombine.low %v57_v21, %v56_v23  ;;  %v63_v25 = vcombine.low %v55_v22, %v54_v20  ;;  %vm1250_vm0 = vcmask 1048512  }
  0x8f   :  { %v70_v26 = vrot.slane %v62_v24, %v1412_v18  ;;  %v77_v27 = vrot.slane %v63_v25, %v1412_v18 }
  0x91   :  { %v78_v28 = vcombine.low %v70_v26, %v77_v27 }
  0x93   :  { %v85_v29 = vrot.slane %v78_v28, %v1412_v18 }
  0x95   :  { %v87_v30 = vmax.f32 %v21_v6, %v85_v29 }
  0x97   :  { %v96_v31 = vrot.slane %v87_v30, %v29_v5  ;;  %v92_v32 = vrot.slane %v87_v30, %v25_v3  ;;  %v104_v33 = vrot.slane %v87_v30, %v37_v4  ;;  %v100_v34 = vrot.slane %v87_v30, %v33_v2 }
  0x99   :  { %111 = vrot.lane.b32.xlu1 %v96_v31, %s1355_s0  ;;  %109 = vrot.lane.b32.xlu0 %v92_v32, %s1355_s0 }
  0x9d   :  { %115 = vrot.lane.b32.xlu1 %v104_v33, %s1355_s0  ;;  %113 = vrot.lane.b32.xlu0 %v100_v34, %s1355_s0  ;;  %s1386_s0 = smov 12  }
 0x10b   :  { %v112_v35 = vpop.permute.xlu1 %111  ;;  %v110_v36 = vpop.permute.xlu0 %109 }
 0x10c   :  { %v120_v39 = vsel %vm117_vm1, %v110_v36, %v112_v35 }
 0x10f   :  { %v116_v37 = vpop.permute.xlu1 %115  ;;  %v114_v38 = vpop.permute.xlu0 %113 }
 0x110   :  { %v121_v40 = vsel %vm117_vm1, %v116_v37, %v110_v36  ;;  %v118_v41 = vsel %vm117_vm1, %v114_v38, %v116_v37  ;;  %v119_v42 = vsel %vm117_vm1, %v112_v35, %v114_v38 }
 0x111   :  { %v126_v43 = vcombine.low %v121_v40, %v120_v39  ;;  %v127_v44 = vcombine.low %v119_v42, %v118_v41 }
 0x113   :  { %v134_v45 = vrot.slane %v126_v43, %v1412_v18  ;;  %v141_v46 = vrot.slane %v127_v44, %v1412_v18 }
 0x115   :  { %v142_v47 = vcombine.low %v134_v45, %v141_v46 }
 0x117   :  { %v149_v48 = vrot.slane %v142_v47, %v1412_v18 }
 0x119   :  { %v1421_v49 = vmax.f32 %v87_v30, %v149_v48 }
 0x11b   :  { %157 = vrot.lane.b32.xlu1 %v1421_v49, %s1356_s12  ;;  %154 = vrot.lane.b32.xlu0 %v1421_v49, %s1357_s13  ;;  %s1387_s12 = smov 4   ;;  %v153_v58 = vrot.slane %v1421_v49, 1  ;;  %v247_v7 = vrot.slane %v1421_v49, 2  ;;  %v279_v8 = vrot.slane %v1421_v49, 3  ;;  %s1388_s13 = smov [#allocation5]  }
 0x11f   :  { %163 = vrot.lane.b32.xlu1 %v1421_v49, %s1358_s14  ;;  %160 = vrot.lane.b32.xlu0 %v1421_v49, %s1359_s15  ;;  %s1260_s14 = sshll.u32 %s1388_s13, 4  ;;  %s1261_s14 = int_to_ptr.vmem [resolvable:$true] %s1260_s14 }
 0x120   :  { %s1328_s15 = scalar_lea.vmem %s1261_s14, 16  ;;  %p1333_p6 = scmp.lt.s32.totalorder %s1261_s14, %s1261_s14 }
 0x121   :  { %p1329_p5 = scmp.ne.s32.totalorder %s1261_s14, %s1328_s15 }
 0x123   :  { %169 = vrot.lane.b32.xlu1 %v1421_v49, %s1360_s16  ;;  %166 = vrot.lane.b32.xlu0 %v1421_v49, %s1361_s17  ;;  %s1332_s16 = scalar_lea.vmem %s1261_s14, 32 }
 0x124   :  { %p1334_p7 = scmp.lt.s32.totalorder %s1332_s16, %s1328_s15 }
 0x126   :  { %p1335_p8 = por %p1334_p7, %p1333_p6 }
 0x127   :  { %175 = vrot.lane.b32.xlu1 %v1421_v49, %s1363_s18  ;;  %172 = vrot.lane.b32.xlu0 %v1421_v49, %s1364_s19 }
 0x128   :  { %p1336_p9 = pnand %p1335_p8, %p1329_p5 }
 0x12b   :  { %181 = vrot.lane.b32.xlu1 %v1421_v49, %s1365_s20  ;;  %178 = vrot.lane.b32.xlu0 %v1421_v49, %s1366_s21 }
 0x12f   :  { %187 = vrot.lane.b32.xlu1 %v1421_v49, %s1367_s22  ;;  %184 = vrot.lane.b32.xlu0 %v1421_v49, %s1368_s23 }
 0x133   :  { %193 = vrot.lane.b32.xlu1 %v1421_v49, %s1369_s24  ;;  %190 = vrot.lane.b32.xlu0 %v1421_v49, %s1370_s25 }
 0x137   :  { %199 = vrot.lane.b32.xlu1 %v1421_v49, %s1371_s26  ;;  %196 = vrot.lane.b32.xlu0 %v1421_v49, %s1372_s27 }
 0x13b   :  { %205 = vrot.lane.b32.xlu1 %v1421_v49, %s1373_s28  ;;  %202 = vrot.lane.b32.xlu0 %v1421_v49, %s1374_s29 }
 0x13f   :  { %211 = vrot.lane.b32.xlu1 %v1421_v49, %s1375_s30  ;;  %208 = vrot.lane.b32.xlu0 %v1421_v49, %s1376_s2 }
 0x143   :  { %217 = vrot.lane.b32.xlu1 %v1421_v49, %s1377_s3  ;;  %214 = vrot.lane.b32.xlu0 %v1421_v49, %s1378_s4 }
 0x147   :  { %223 = vrot.lane.b32.xlu1 %v1421_v49, %s1379_s5  ;;  %220 = vrot.lane.b32.xlu0 %v1421_v49, %s1380_s6 }
 0x14b   :  { %229 = vrot.lane.b32.xlu1 %v1421_v49, %s1381_s7  ;;  %226 = vrot.lane.b32.xlu0 %v1421_v49, %s1382_s8 }
 0x14f   :  { %235 = vrot.lane.b32.xlu1 %v1421_v49, %s1383_s9  ;;  %232 = vrot.lane.b32.xlu0 %v1421_v49, %s1384_s10 }
 0x153   :  { %241 = vrot.lane.b32.xlu1 %v1421_v49, %s1385_s11  ;;  %238 = vrot.lane.b32.xlu0 %v1421_v49, %s1386_s0 }
 0x157   :  { %244 = vrot.lane.b32.xlu0 %v1421_v49, %s1387_s12 }
 0x18d   :  { %v158_v51 = vpop.permute.xlu1 %157  ;;  %v155_v52 = vpop.permute.xlu0 %154 }
 0x18e   :  { %v156_v55 = vrot.slane %v155_v52, 1  ;;  %v311_v59 = vcombine.low %v1421_v49, %v155_v52  ;;  %v248_v60 = vrot.slane %v155_v52, 2  ;;  %v280_v61 = vrot.slane %v155_v52, 3 }
 0x18f   :  { %v159_v5 = vrot.slane %v158_v51, 1  ;;  %v249_v6 = vrot.slane %v158_v51, 2  ;;  %v281_v9 = vrot.slane %v158_v51, 3 }
 0x190   :  { %v507_v0 = vcombine.low %v153_v58, %v156_v55  ;;  %v321_v10 = vrot.slane %v311_v59, %v1412_v18  ;;  %v703_v14 = vcombine.low %v247_v7, %v248_v60  ;;  %v1463_v15 = vcombine.low %v279_v8, %v280_v61 }
 0x191   :  { %v164_v53 = vpop.permute.xlu1 %163  ;;  %v161_v54 = vpop.permute.xlu0 %160 }
 0x192   :  { %v162_v62 = vrot.slane %v161_v54, 1  ;;  %v250_v63 = vrot.slane %v161_v54, 2  ;;  %v312_v2 = vcombine.low %v158_v51, %v161_v54  ;;  %v282_v11 = vrot.slane %v161_v54, 3 }
 0x193   :  { %v517_v19 = vrot.slane %v507_v0, %v1412_v18  ;;  %v165_v25 = vrot.slane %v164_v53, 1  ;;  %v251_v26 = vrot.slane %v164_v53, 2  ;;  %v283_v29 = vrot.slane %v164_v53, 3 }
 0x194   :  { %v508_v16 = vcombine.low %v159_v5, %v162_v62  ;;  %v704_v17 = vcombine.low %v249_v6, %v250_v63  ;;  %v328_v20 = vrot.slane %v312_v2, %v1412_v18  ;;  %v1472_v30 = vcombine.low %v281_v9, %v282_v11 }
 0x195   :  { %v1454_v56 = vpop.permute.xlu1 %169  ;;  %v167_v57 = vpop.permute.xlu0 %166  ;;  %v713_v37 = vrot.slane %v703_v14, %v1412_v18 }
 0x196   :  { %v313_v12 = vcombine.low %v164_v53, %v167_v57  ;;  %v168_v21 = vrot.slane %v167_v57, 1  ;;  %v252_v27 = vrot.slane %v167_v57, 2  ;;  %v524_v33 = vrot.slane %v508_v16, %v1412_v18 }
 0x197   :  { %v720_v34 = vrot.slane %v704_v17, %v1412_v18  ;;  %v171_v35 = vrot.slane %v1454_v56, 1  ;;  %v284_v36 = vrot.slane %v167_v57, 3  ;;  %v343_v41 = vcombine.low %v321_v10, %v328_v20 }
 0x198   :  { %v335_v31 = vrot.slane %v313_v12, %v1412_v18  ;;  %v509_v38 = vcombine.low %v165_v25, %v168_v21  ;;  %v253_v44 = vrot.slane %v1454_v56, 2  ;;  %v1487_v45 = vcombine.low %v251_v26, %v252_v27 }
 0x199   :  { %v1458_v3 = vpop.permute.xlu1 %175  ;;  %v173_v4 = vpop.permute.xlu0 %172  ;;  %v285_v48 = vrot.slane %v1454_v56, 3  ;;  %v1492_v51 = vcombine.low %v283_v29, %v284_v36  ;;  %v1495_v53 = vcombine.low %v517_v19, %v524_v33  ;;  %v1497_v54 = vcombine.low %v713_v37, %v720_v34 }
 0x19a   :  { %v314_v22 = vcombine.low %v1454_v56, %v173_v4  ;;  %v174_v28 = vrot.slane %v173_v4, 1  ;;  %v254_v49 = vrot.slane %v173_v4, 2  ;;  %v286_v50 = vrot.slane %v173_v4, 3 }
 0x19b   :  { %v177_v52 = vrot.slane %v1458_v3, 1  ;;  %v531_v55 = vrot.slane %v509_v38, %v1412_v18  ;;  %v351_v58 = vrot.slane %v343_v41, %v1412_v18  ;;  %v727_v61 = vrot.slane %v1487_v45, %v1412_v18 }
 0x19c   :  { %v342_v32 = vrot.slane %v314_v22, %v1412_v18  ;;  %v510_v46 = vcombine.low %v171_v35, %v174_v28  ;;  %v255_v62 = vrot.slane %v1458_v3, 2  ;;  %v287_v63 = vrot.slane %v1458_v3, 3 }
 0x19d   :  { %v1468_v23 = vpop.permute.xlu1 %181  ;;  %v1470_v24 = vpop.permute.xlu0 %178  ;;  %v1512_v2 = vcombine.low %v253_v44, %v254_v49  ;;  %v1514_v4 = vcombine.low %v285_v48, %v286_v50  ;;  %v547_v10 = vrot.slane %v1495_v53, %v1412_v18 }
 0x19e   :  { %v344_v42 = vcombine.low %v335_v31, %v342_v32  ;;  %v180_v57 = vrot.slane %v1470_v24, 1  ;;  %v538_v0 = vrot.slane %v510_v46, %v1412_v18  ;;  %v256_v5 = vrot.slane %v1470_v24, 2 }
 0x19f   :  { %v183_v8 = vrot.slane %v1468_v23, 1  ;;  %v288_v9 = vrot.slane %v1470_v24, 3  ;;  %v257_v11 = vrot.slane %v1468_v23, 2  ;;  %v360_v12 = vcombine.low %v1458_v3, %v1470_v24 }
 0x1a0   :  { %v358_v59 = vrot.slane %v344_v42, %v1412_v18  ;;  %v1526_v14 = vcombine.low %v177_v52, %v180_v57  ;;  %v289_v20 = vrot.slane %v1468_v23, 3  ;;  %v540_v25 = vcombine.low %v531_v55, %v538_v0 }
 0x1a1   :  { %v1480_v39 = vpop.permute.xlu1 %187  ;;  %v1482_v40 = vpop.permute.xlu0 %184  ;;  %v734_v26 = vrot.slane %v1512_v2, %v1412_v18  ;;  %v1539_v24 = vcombine.low %v255_v62, %v256_v5  ;;  %v1543_v28 = vcombine.low %v287_v63, %v288_v9  ;;  %v370_v32 = vrot.slane %v360_v12, %v1412_v18 }
 0x1a2   :  { %v359_v6 = vcombine.low %v351_v58, %v358_v59  ;;  %v361_v16 = vcombine.low %v1468_v23, %v1482_v40  ;;  %v186_v21 = vrot.slane %v1482_v40, 1  ;;  %v258_v22 = vrot.slane %v1482_v40, 2 }
 0x1a3   :  { %v189_v23 = vrot.slane %v1480_v39, 1  ;;  %v259_v29 = vrot.slane %v1480_v39, 2  ;;  %v290_v31 = vrot.slane %v1482_v40, 3  ;;  %v291_v38 = vrot.slane %v1480_v39, 3 }
 0x1a4   :  { %1096 = vperm.xlu1 %1306, %v359_v6   ;;  %v377_v34 = vrot.slane %v361_v16, %v1412_v18  ;;  %v1558_v41 = vcombine.low %v183_v8, %v186_v21  ;;  %v1560_v42 = vcombine.low %v257_v11, %v258_v22  ;;  %v554_v40 = vrot.slane %v540_v25, %v1412_v18 }
 0x1a5   :  { %v1503_v60 = vpop.permute.xlu1 %193  ;;  %v1505_v56 = vpop.permute.xlu0 %190  ;;  %v1569_v52 = vcombine.low %v289_v20, %v290_v31 }
 0x1a6   :  { %v362_v27 = vcombine.low %v1480_v39, %v1505_v56  ;;  %v192_v44 = vrot.slane %v1505_v56, 1  ;;  %v260_v46 = vrot.slane %v1505_v56, 2  ;;  %v292_v55 = vrot.slane %v1505_v56, 3 }
 0x1a7   :  { %v392_v62 = vcombine.low %v370_v32, %v377_v34  ;;  %v195_v5 = vrot.slane %v1503_v60, 1  ;;  %v261_v6 = vrot.slane %v1503_v60, 2  ;;  %v293_v8 = vrot.slane %v1503_v60, 3 }
 0x1a8   :  { %v384_v48 = vrot.slane %v362_v27, %v1412_v18  ;;  %v1583_v56 = vcombine.low %v189_v23, %v192_v44  ;;  %v1585_v11 = vcombine.low %v259_v29, %v260_v46  ;;  %v555_v12 = vcombine.low %v547_v10, %v554_v40 }
 0x1a9   :  { %v1530_v17 = vpop.permute.xlu1 %199  ;;  %v197_v19 = vpop.permute.xlu0 %196  ;;  %v1593_v22 = vcombine.low %v291_v38, %v292_v55 }
 0x1aa   :  { %v363_v35 = vcombine.low %v1503_v60, %v197_v19  ;;  %v198_v39 = vrot.slane %v197_v19, 1  ;;  %v262_v53 = vrot.slane %v197_v19, 2  ;;  %v294_v57 = vrot.slane %v197_v19, 3 }
 0x1ab   :  { %v201_v16 = vrot.slane %v1530_v17, 1  ;;  %v263_v19 = vrot.slane %v1530_v17, 2  ;;  %v400_v60 = vrot.slane %v392_v62, %v1412_v18  ;;  %v295_v10 = vrot.slane %v1530_v17, 3 }
 0x1ac   :  { %v391_v49 = vrot.slane %v363_v35, %v1412_v18  ;;  %v1589_v20 = vcombine.low %v195_v5, %v198_v39  ;;  %v1591_v21 = vcombine.low %v261_v6, %v262_v53  ;;  %v1595_v25 = vcombine.low %v293_v8, %v294_v57 }
 0x1ad   :  { %v1553_v36 = vpop.permute.xlu1 %205  ;;  %v1555_v37 = vpop.permute.xlu0 %202 }
 0x1ae   :  { %v393_v63 = vcombine.low %v384_v48, %v391_v49  ;;  %v204_v31 = vrot.slane %v1555_v37, 1  ;;  %v264_v32 = vrot.slane %v1555_v37, 2  ;;  %v296_v34 = vrot.slane %v1555_v37, 3 }
 0x1af   :  { %v207_v40 = vrot.slane %v1553_v36, 1  ;;  %v265_v49 = vrot.slane %v1553_v36, 2  ;;  %v297_v39 = vrot.slane %v1553_v36, 3  ;;  %v409_v55 = vcombine.low %v1530_v17, %v1555_v37 }
 0x1b0   :  { %v407_v27 = vrot.slane %v393_v63, %v1412_v18  ;;  %v605_v6 = vcombine.low %v201_v16, %v204_v31  ;;  %v1625_v8 = vcombine.low %v263_v19, %v264_v32  ;;  %v1635_v17 = vcombine.low %v727_v61, %v734_v26 }
 0x1b1   :  { %v1572_v58 = vpop.permute.xlu1 %211  ;;  %v1574_v59 = vpop.permute.xlu0 %208  ;;  %v419_v53 = vrot.slane %v409_v55, %v1412_v18 }
 0x1b2   :  { %v408_v44 = vcombine.low %v400_v60, %v407_v27  ;;  %v210_v57 = vrot.slane %v1574_v59, 1  ;;  %v410_v62 = vcombine.low %v1553_v36, %v1574_v59  ;;  %v1627_v60 = vcombine.low %v295_v10, %v296_v34 }
 0x1b3   :  { %v213_v16 = vrot.slane %v1572_v58, 1  ;;  %v267_v19 = vrot.slane %v1572_v58, 2  ;;  %v266_v10 = vrot.slane %v1574_v59, 2  ;;  %v298_v31 = vrot.slane %v1574_v59, 3 }
 0x1b4   :  { %1099 = vperm.xlu0 %1307, %v408_v44   ;;  %v426_v2 = vrot.slane %v410_v62, %v1412_v18  ;;  %v606_v32 = vcombine.low %v207_v40, %v210_v57  ;;  %v615_v50 = vrot.slane %v605_v6, %v1412_v18  ;;  %v299_v48 = vrot.slane %v1572_v58, 3 }
 0x1b5   :  { %v1599_v23 = vpop.permute.xlu1 %217  ;;  %v215_v29 = vpop.permute.xlu0 %214  ;;  %v1654_v40 = vcombine.low %v265_v49, %v266_v10  ;;  %v1656_v57 = vcombine.low %v297_v39, %v298_v31  ;;  %v811_v39 = vrot.slane %v1625_v8, %v1412_v18  ;;  %v743_v31 = vrot.slane %v1497_v54, %v1412_v18 }
 0x1b6   :  { %v219_v37 = vrot.slane %v1599_v23, 1  ;;  %v216_v36 = vrot.slane %v215_v29, 1  ;;  %v411_v27 = vcombine.low %v1572_v58, %v215_v29  ;;  %v268_v9 = vrot.slane %v215_v29, 2 }
 0x1b7   :  { %v300_v38 = vrot.slane %v215_v29, 3  ;;  %v622_v35 = vrot.slane %v606_v32, %v1412_v18  ;;  %v441_v58 = vcombine.low %v419_v53, %v426_v2  ;;  %v818_v53 = vrot.slane %v1654_v40, %v1412_v18 }
 0x1b8   :  { %1108 = vperm.xlu0 %1307, %v555_v12   ;;  %v433_v59 = vrot.slane %v411_v27, %v1412_v18  ;;  %v607_v62 = vcombine.low %v213_v16, %v216_v36  ;;  %v269_v36 = vrot.slane %v1599_v23, 2  ;;  %v301_v27 = vrot.slane %v1599_v23, 3 }
 0x1b9   :  { %v1623_v63 = vpop.permute.xlu1 %223  ;;  %v221_v5 = vpop.permute.xlu0 %220  ;;  %v803_v49 = vcombine.low %v267_v19, %v268_v9  ;;  %v1666_v16 = vcombine.low %v299_v48, %v300_v38  ;;  %v449_v48 = vrot.slane %v441_v58, %v1412_v18  ;;  %v637_v2 = vcombine.low %v615_v50, %v622_v35 }
 0x1ba   :  { %v222_v44 = vrot.slane %v221_v5, 1  ;;  %v412_v45 = vcombine.low %v1599_v23, %v221_v5  ;;  %v629_v10 = vrot.slane %v607_v62, %v1412_v18 }
 0x1bb   :  { %v1021_v54 = vrot.slane %v1666_v16, %v1412_v18 }
 0x1bc   :  { %v608_v61 = vcombine.low %v219_v37, %v222_v44  ;;  %v440_v12 = vrot.slane %v412_v45, %v1412_v18  ;;  %v270_v37 = vrot.slane %v221_v5, 2  ;;  %v302_v44 = vrot.slane %v221_v5, 3 }
 0x1bd   :  { %v1645_v26 = vpop.permute.xlu1 %229  ;;  %v1647_v34 = vpop.permute.xlu0 %226  ;;  %v825_v45 = vrot.slane %v803_v49, %v1412_v18 }
 0x1be   :  { %v636_v55 = vrot.slane %v608_v61, %v1412_v18  ;;  %v442_v46 = vcombine.low %v433_v59, %v440_v12  ;;  %v804_v9 = vcombine.low %v269_v36, %v270_v37  ;;  %v1679_v38 = vcombine.low %v301_v27, %v302_v44 }
 0x1bf   :  { %v225_v61 = vrot.slane %v1623_v63, 1  ;;  %v231_v62 = vrot.slane %v1645_v26, 1  ;;  %v273_v12 = vrot.slane %v1645_v26, 2  ;;  %v228_v40 = vrot.slane %v1647_v34, 1 }
 0x1c0   :  { %v456_v8 = vrot.slane %v442_v46, %v1412_v18  ;;  %v638_v32 = vcombine.low %v629_v10, %v636_v55  ;;  %v832_v50 = vrot.slane %v804_v9, %v1412_v18  ;;  %v1028_v35 = vrot.slane %v1679_v38, %v1412_v18 }
 0x1c1   :  { %v1660_v6 = vpop.permute.xlu1 %235  ;;  %v1662_v29 = vpop.permute.xlu0 %232  ;;  %v458_v44 = vcombine.low %v1623_v63, %v1647_v34  ;;  %v645_v27 = vrot.slane %v637_v2, %v1412_v18  ;;  %v272_v10 = vrot.slane %v1647_v34, 2  ;;  %v750_v2 = vrot.slane %v1635_v17, %v1412_v18 }
 0x1c2   :  { %v457_v46 = vcombine.low %v449_v48, %v456_v8  ;;  %v459_v55 = vcombine.low %v1645_v26, %v1662_v29  ;;  %v234_v58 = vrot.slane %v1662_v29, 1  ;;  %v652_v49 = vrot.slane %v638_v32, %v1412_v18 }
 0x1c3   :  { %v654_v8 = vcombine.low %v225_v61, %v228_v40  ;;  %v275_v32 = vrot.slane %v1660_v6, 2  ;;  %v468_v0 = vrot.slane %v458_v44, %v1412_v18  ;;  %v274_v43 = vrot.slane %v1662_v29, 2 }
 0x1c4   :  { %1102 = vperm.xlu1 %1306, %v457_v46   ;;  %v237_v46 = vrot.slane %v1660_v6, 1  ;;  %v653_v59 = vcombine.low %v645_v27, %v652_v49  ;;  %v475_v5 = vrot.slane %v459_v55, %v1412_v18  ;;  %v655_v47 = vcombine.low %v231_v62, %v234_v58 }
 0x1c5   :  { %v1683_v19 = vpop.permute.xlu0 %238  ;;  %v1693_v37 = vpop.permute.xlu1 %241  ;;  %v833_v17 = vcombine.low %v811_v39, %v818_v53  ;;  %v834_v49 = vcombine.low %v825_v45, %v832_v50  ;;  %v751_v3 = vcombine.low %v743_v31, %v750_v2  ;;  %v1858_v44 = vrot.slane %v1492_v51, %v1412_v18 }
 0x1c6   :  { %v240_v36 = vrot.slane %v1683_v19, 1  ;;  %v243_v9 = vrot.slane %v1693_v37, 1  ;;  %v460_v38 = vcombine.low %v1660_v6, %v1683_v19  ;;  %1114 = vperm.xlu0 %1307, %v653_v59   ;;  %v277_v7 = vrot.slane %v1693_v37, 2 }
 0x1c7   :  { %v848_v58 = vrot.slane %v834_v49, %v1412_v18  ;;  %v671_v39 = vrot.slane %v655_v47, %v1412_v18  ;;  %v276_v53 = vrot.slane %v1683_v19, 2  ;;  %v841_v31 = vrot.slane %v833_v17, %v1412_v18 }
 0x1c8   :  { %v656_v61 = vcombine.low %v237_v46, %v240_v36  ;;  %v482_v40 = vrot.slane %v460_v38, %v1412_v18  ;;  %v490_v36 = vcombine.low %v468_v0, %v475_v5  ;;  %v1860_v51 = vrot.slane %v1463_v15, %v1412_v18 }
 0x1c9   :  { %v1706_v16 = vpop.permute.xlu0 %244  ;;  %v1861_v47 = vrot.slane %v1558_v41, %v1412_v18  ;;  %v849_v38 = vcombine.low %v841_v31, %v848_v58  ;;  %v1863_v15 = vrot.slane %v1589_v20, %v1412_v18  ;;  %v1864_v46 = vrot.slane %v1583_v56, %v1412_v18 }
 0x1ca   :  { %v246_v48 = vrot.slane %v1706_v16, 1  ;;  %v461_v23 = vcombine.low %v1693_v37, %v1706_v16  ;;  %v278_v55 = vrot.slane %v1706_v16, 2  ;;  %1120 = vperm.xlu0 %1307, %v751_v3   ;;  %v498_v50 = vrot.slane %v490_v36, %v1412_v18 }
 0x1cb   :  { %v1862_v3 = vrot.slane %v1526_v14, %v1412_v18  ;;  %v589_v2 = vcombine.low %v1864_v46, %v1863_v15  ;;  %v851_v17 = vcombine.low %v273_v12, %v274_v43  ;;  %v1865_v49 = vrot.slane %v1656_v57, %v1412_v18 }
 0x1cc   :  { %v657_v33 = vcombine.low %v243_v9, %v246_v48  ;;  %v489_v27 = vrot.slane %v461_v23, %v1412_v18  ;;  %v1857_v9 = vrot.slane %v1514_v4, %v1412_v18  ;;  %v1859_v4 = vrot.slane %v1472_v30, %v1412_v18 }
 0x1cd   :  { %v588_v5 = vcombine.low %v1862_v3, %v1861_v47  ;;  %v1030_v48 = vcombine.low %v1021_v54, %v1028_v35  ;;  %v1866_v54 = vrot.slane %v1627_v60, %v1412_v18  ;;  %v603_v35 = vrot.slane %v589_v2, %v1412_v18 }
 0x1ce   :  { %v932_v62 = vcombine.low %v1858_v44, %v1857_v9  ;;  %v685_v59 = vrot.slane %v657_v33, %v1412_v18  ;;  %v491_v23 = vcombine.low %v482_v40, %v489_v27  ;;  %v931_v45 = vcombine.low %v1860_v51, %v1859_v4  ;;  %1126 = vperm.xlu0 %1307, %v849_v38  }
 0x1cf   :  { %v678_v33 = vrot.slane %v656_v61, %v1412_v18  ;;  %v664_v61 = vrot.slane %v654_v8, %v1412_v18  ;;  %v853_v40 = vcombine.low %v277_v7, %v278_v55  ;;  %v1029_v20 = vcombine.low %v1866_v54, %v1865_v49 }
 0x1d0   :  { %v505_v0 = vrot.slane %v491_v23, %v1412_v18  ;;  %v946_v30 = vrot.slane %v932_v62, %v1412_v18  ;;  %v939_v14 = vrot.slane %v931_v45, %v1412_v18  ;;  %v305_v56 = vrot.slane %v1645_v26, 3 }
 0x1d1   :  { %v687_v41 = vcombine.low %v678_v33, %v685_v59  ;;  %v852_v9 = vcombine.low %v275_v32, %v276_v53  ;;  %v596_v7 = vrot.slane %v588_v5, %v1412_v18  ;;  %v686_v8 = vcombine.low %v664_v61, %v671_v39 }
 0x1d2   :  { %v506_v27 = vcombine.low %v498_v50, %v505_v0  ;;  %v1867_v43 = vrot.slane %v1623_v63, 2  ;;  %v310_v55 = vrot.slane %v1706_v16, 3  ;;  %v947_v44 = vcombine.low %v939_v14, %v946_v30 }
 0x1d3   :  { %v1044_v57 = vrot.slane %v1030_v48, %v1412_v18  ;;  %v881_v60 = vrot.slane %v853_v40, %v1412_v18  ;;  %v604_v62 = vcombine.low %v596_v7, %v603_v35  ;;  %v701_v59 = vrot.slane %v687_v41, %v1412_v18 }
 0x1d4   :  { %1105 = vperm.xlu1 %1306, %v506_v27   ;;  %v850_v12 = vcombine.low %v1867_v43, %v272_v10  ;;  %v1868_v26 = vrot.slane %v1591_v21, %v1412_v18  ;;  %v1869_v32 = vrot.slane %v1585_v11, %v1412_v18  ;;  %v306_v36 = vrot.slane %v1662_v29, 3  ;;  %1132 = vperm.xlu0 %1307, %v947_v44  }
 0x1d5   :  { %v867_v10 = vrot.slane %v851_v17, %v1412_v18  ;;  %v309_v16 = vrot.slane %v1693_v37, 3  ;;  %v1037_v23 = vrot.slane %v1029_v20, %v1412_v18  ;;  %v308_v39 = vrot.slane %v1683_v19, 3 }
 0x1d6   :  { %v785_v58 = vcombine.low %v1869_v32, %v1868_v26  ;;  %v874_v53 = vrot.slane %v852_v9, %v1412_v18  ;;  %v694_v21 = vrot.slane %v686_v8, %v1412_v18  ;;  %v1870_v11 = vrot.slane %v1560_v42, %v1412_v18 }
 0x1d7   :  { %v1871_v29 = vrot.slane %v1539_v24, %v1412_v18  ;;  %v304_v4 = vrot.slane %v1647_v34, 3  ;;  %v860_v37 = vrot.slane %v850_v12, %v1412_v18  ;;  %v307_v51 = vrot.slane %v1660_v6, 3 }
 0x1d8   :  { %1111 = vperm.xlu1 %1306, %v604_v62   ;;  %v1045_v45 = vcombine.low %v1037_v23, %v1044_v57  ;;  %v1049_v19 = vcombine.low %v309_v16, %v310_v55  ;;  %v702_v33 = vcombine.low %v694_v21, %v701_v59  ;;  %v799_v50 = vrot.slane %v785_v58, %v1412_v18 }
 0x1d9   :  { %v784_v31 = vcombine.low %v1871_v29, %v1870_v11  ;;  %v883_v0 = vcombine.low %v874_v53, %v881_v60  ;;  %v965_v47 = vrot.slane %v1569_v52, %v1412_v18  ;;  %v972_v42 = vrot.slane %v1593_v22, %v1412_v18 }
 0x1da   :  { %v303_v24 = vrot.slane %v1623_v63, 3  ;;  %1138 = vperm.xlu0 %1307, %v1045_v45   ;;  %v1047_v34 = vcombine.low %v305_v56, %v306_v36  ;;  %v1048_v3 = vcombine.low %v307_v51, %v308_v39  ;;  %v882_v5 = vcombine.low %v860_v37, %v867_v10 }
 0x1db   :  { %v792_v6 = vrot.slane %v784_v31, %v1412_v18  ;;  %v958_v38 = vrot.slane %v1543_v28, %v1412_v18  ;;  %v1077_v48 = vrot.slane %v1049_v19, %v1412_v18  ;;  %v897_v52 = vrot.slane %v883_v0, %v1412_v18 }
 0x1dc   :  { %1117 = vperm.xlu1 %1306, %v702_v33   ;;  %v1046_v30 = vcombine.low %v303_v24, %v304_v4  ;;  %v1872_v22 = vrot.slane %v1595_v25, %v1412_v18  ;;  %v1063_v46 = vrot.slane %v1047_v34, %v1412_v18  ;;  %v1070_v2 = vrot.slane %v1048_v3, %v1412_v18 }
 0x1dd   :  { %v800_v15 = vcombine.low %v792_v6, %v799_v50  ;;  %v890_v61 = vrot.slane %v882_v5, %v1412_v18  ;;  %v980_v40 = vcombine.low %v958_v38, %v965_v47  ;;  %v1147_v9 = vadd.s32 4294967288, %v1408_v13 }
 0x1de   :  { %v981_v63 = vcombine.low %v972_v42, %v1872_v22  ;;  %v1056_v28 = vrot.slane %v1046_v30, %v1412_v18  ;;  %v1079_v17 = vcombine.low %v1070_v2, %v1077_v48  ;;  %v1154_v7 = vadd.s32 4294967280, %v1408_v13 }
 0x1df   :  { %v898_v27 = vcombine.low %v890_v61, %v897_v52  ;;  %v988_v14 = vrot.slane %v980_v40, %v1412_v18  ;;  %v1150_v43 = vsub.s32 %v1147_v9, %v1402_v1  ;;  %v1161_v55 = vadd.s32 4294967272, %v1408_v13 }
 0x1e0   :  { %1123 = vperm.xlu1 %1306, %v800_v15   ;;  %v995_v41 = vrot.slane %v981_v63, %v1412_v18  ;;  %v1078_v49 = vcombine.low %v1056_v28, %v1063_v46  ;;  %v1093_v54 = vrot.slane %v1079_v17, %v1412_v18  ;;  %v1157_v44 = vsub.s32 %v1154_v7, %v1402_v1 }
 0x1e1   :  { %v1145_v57 = vsub.s32 %v1408_v13, %v1402_v1  ;;  %v1164_v26 = vsub.s32 %v1161_v55, %v1402_v1  ;;  %v1175_v32 = vadd.s32 4294967256, %v1408_v13  ;;  %v1182_v16 = vadd.s32 4294967248, %v1408_v13 }
 0x1e2   :  { %v996_v25 = vcombine.low %v988_v14, %v995_v41  ;;  %v1086_v20 = vrot.slane %v1078_v49, %v1412_v18  ;;  %v1168_v18 = vadd.s32 4294967264, %v1408_v13  ;;  %v1189_v11 = vadd.s32 4294967240, %v1408_v13 }
 0x1e3   :  { %v1178_v21 = vsub.s32 %v1175_v32, %v1402_v1  ;;  %v1185_v51 = vsub.s32 %v1182_v16, %v1402_v1  ;;  %v1196_v45 = vadd.s32 4294967232, %v1408_v13  ;;  %v1203_v0 = vadd.s32 4294967224, %v1408_v13 }
 0x1e4   :  { %1129 = vperm.xlu1 %1306, %v898_v27   ;;  %v1094_v35 = vcombine.low %v1086_v20, %v1093_v54  ;;  %v1171_v10 = vsub.s32 %v1168_v18, %v1402_v1  ;;  %v1192_v50 = vsub.s32 %v1189_v11, %v1402_v1  ;;  %v1210_v3 = vadd.s32 4294967216, %v1408_v13 }
 0x1e5   :  { %v1199_v34 = vsub.s32 %v1196_v45, %v1402_v1  ;;  %v1206_v30 = vsub.s32 %v1203_v0, %v1402_v1  ;;  %v1217_v48 = vadd.s32 4294967208, %v1408_v13  ;;  %v1224_v46 = vadd.s32 4294967200, %v1408_v13 }
 0x1e6   :  { %v1213_v63 = vsub.s32 %v1210_v3, %v1402_v1  ;;  %v1231_v28 = vadd.s32 4294967192, %v1408_v13 }
 0x1e7   :  { %v1220_v40 = vsub.s32 %v1217_v48, %v1402_v1  ;;  %v1227_v49 = vsub.s32 %v1224_v46, %v1402_v1 }
 0x1e8   :  { %1135 = vperm.xlu1 %1306, %v996_v25   ;;  %v1238_v25 = vadd.s32 4294967184, %v1408_v13 }
 0x1ec   :  { %1141 = vperm.xlu1 %1306, %v1094_v35   ;;  %v1234_v35 = vsub.s32 %v1231_v28, %v1402_v1 }
 0x21f   :  { %v1097_v8 = vpop.permute.xlu1 %1096 }
 0x220   :  { %v1146_v36 = vrot.slane %v1097_v8, %v1145_v57 }
 0x22f   :  { %v1100_v56 = vpop.permute.xlu0 %1099 }
 0x230   :  { %v1151_v62 = vrot.slane %v1100_v56, %v1150_v43  ;;  %v1245_v56 = vadd.s32 4294967176, %v1408_v13  ;;  %v1241_v43 = vsub.s32 %v1238_v25, %v1402_v1 }
 0x232   :  { %v1153_v39 = vsel %vm1152_vm2, %v1151_v62, %v1146_v36  ;;  %v1248_v57 = vsub.s32 %v1245_v56, %v1402_v1 }
 0x233   :  { %v1109_v12 = vpop.permute.xlu0 %1108 }
 0x234   :  { %v1172_v37 = vrot.slane %v1109_v12, %v1171_v10 }
 0x23f   :  { %v1103_v60 = vpop.permute.xlu1 %1102 }
 0x240   :  { %v1158_v58 = vrot.slane %v1103_v60, %v1157_v44 }
 0x241   :  { %v1115_v59 = vpop.permute.xlu0 %1114 }
 0x242   :  { %v1160_v29 = vsel %vm1159_vm3, %v1158_v58, %v1153_v39  ;;  %v1186_v24 = vrot.slane %v1115_v59, %v1185_v51 }
 0x245   :  { %v1121_v31 = vpop.permute.xlu0 %1120 }
 0x246   :  { %v1200_v22 = vrot.slane %v1121_v31, %v1199_v34 }
 0x249   :  { %v1127_v5 = vpop.permute.xlu0 %1126 }
 0x24a   :  { %v1214_v14 = vrot.slane %v1127_v5, %v1213_v63 }
 0x24f   :  { %v1106_v23 = vpop.permute.xlu1 %1105  ;;  %v1133_v41 = vpop.permute.xlu0 %1132 }
 0x250   :  { %v1165_v53 = vrot.slane %v1106_v23, %v1164_v26  ;;  %v1228_v8 = vrot.slane %v1133_v41, %v1227_v49 }
 0x252   :  { %v1167_v4 = vsel %vm1166_vm4, %v1165_v53, %v1160_v29 }
 0x253   :  { %v1112_v19 = vpop.permute.xlu1 %1111  ;;  %v1174_v47 = vsel %vm1173_vm5, %v1172_v37, %v1167_v4 }
 0x254   :  { %v1179_v33 = vrot.slane %v1112_v19, %v1178_v21 }
 0x255   :  { %v1139_v55 = vpop.permute.xlu0 %1138 }
 0x256   :  { %v1181_v42 = vsel %vm1180_vm6, %v1179_v33, %v1174_v47  ;;  %v1242_v62 = vrot.slane %v1139_v55, %v1241_v43 }
 0x257   :  { %v1118_v6 = vpop.permute.xlu1 %1117  ;;  %v1188_v15 = vsel %vm1187_vm7, %v1186_v24, %v1181_v42 }
 0x258   :  { %v1193_v38 = vrot.slane %v1118_v6, %v1192_v50 }
 0x25a   :  { %v1195_v52 = vsel %vm1194_vm8, %v1193_v38, %v1188_v15 }
 0x25b   :  { %v1124_v2 = vpop.permute.xlu1 %1123  ;;  %v1202_v27 = vsel %vm1201_vm9, %v1200_v22, %v1195_v52 }
 0x25c   :  { %v1207_v61 = vrot.slane %v1124_v2, %v1206_v30 }
 0x25e   :  { %v1209_v17 = vsel %vm1208_vm10, %v1207_v61, %v1202_v27 }
 0x25f   :  { %v1130_v54 = vpop.permute.xlu1 %1129  ;;  %v1216_v9 = vsel %vm1215_vm11, %v1214_v14, %v1209_v17 }
 0x260   :  { %v1221_v20 = vrot.slane %v1130_v54, %v1220_v40 }
 0x262   :  { %v1223_v7 = vsel %vm1222_vm12, %v1221_v20, %v1216_v9 }
 0x263   :  { %v1136_v12 = vpop.permute.xlu1 %1135  ;;  %v1230_v60 = vsel %vm1229_vm13, %v1228_v8, %v1223_v7 }
 0x264   :  { %v1235_v44 = vrot.slane %v1136_v12, %v1234_v35 }
 0x266   :  { %v1237_v18 = vsel %vm1236_vm14, %v1235_v44, %v1230_v60 }
 0x267   :  { %v1142_v59 = vpop.permute.xlu1 %1141  ;;  %v1244_v26 = vsel %vm1243_vm15, %v1242_v62, %v1237_v18 }
 0x268   :  { %v1249_v13 = vrot.slane %v1142_v59, %v1248_v57 }
 0x26a   :  { %v1251_v32 = vsel %vm1250_vm0, %v1249_v13, %v1244_v26 }
 0x26b   :  { %1253 = vst [vmem:[#allocation5] sm:$0x1] %v1251_v32 }
 0x26c   :  { %1339 = shalt.err (!%p1336_p9)
}
 0x26d   :  { %1263 = dma.vmem_to_hbm [thread:$0]  %s1261_s14, 16, %s1856_s1, [#allocation4]  }
 0x26e   :  { %1350 = dma.done.wait [#allocation4], 16  }
 0x26f   :  { %1351 = vsyncadd [#allocation4], 4294967280 }
 0x270   :  { %1267 = vsyncpa [#allocation3], 1 }
 0x271   :  { %1268 = vsyncpa [#allocation4], 1 }

</bundles_post_ra>
